<compile_context>
chip_gen: v6e
topology: v6e:2x2x1
jax: 0.10.0
libtpu: 0.0.40
codegen_flags: <defaults>
</compile_context>

<pallas_src>
import functools

import jax
import jax.numpy as jnp
from jax.experimental import pallas as pl
from jax.experimental.pallas import tpu as pltpu


# ---------------------------------------------------------------------------
# Parameter preparation (host/JAX side, runs once).
# ---------------------------------------------------------------------------
def fold_affine(params):
    """Collapse a chain of affine layers [(W(in,out), b(1,out)), ...] into one.

    Valid because eval-mode Dropout is identity: (xW1+b1)W2+b2 = x(W1W2) + (b1W2+b2).
    """
    w_eff, b_eff = params[0]
    w_eff = jnp.asarray(w_eff, jnp.float32)
    b_eff = jnp.asarray(b_eff, jnp.float32)
    for w, b in params[1:]:
        w = jnp.asarray(w, jnp.float32)
        b = jnp.asarray(b, jnp.float32)
        b_eff = b_eff @ w + b
        w_eff = w_eff @ w
    return w_eff, b_eff


def prepare_fused_params(params):
    """bf16 weights for the two big matmuls + pre-folded (1,128) tail row."""
    (w1, b1), (w2, b2) = params[0], params[1]
    wt, bt = fold_affine(params[2:])          # (128, 1), (1, 1) in f32
    return (w1.astype(jnp.bfloat16), b1.astype(jnp.float32),
            w2.astype(jnp.bfloat16), b2.astype(jnp.float32),
            wt.T.astype(jnp.float32),          # (1, 128) row for the VPU tail
            bt.astype(jnp.float32))


def _round_up(x, m):
    return ((x + m - 1) // m) * m


# ---------------------------------------------------------------------------
# Kernel 1 (default): fully folded head  ->  y = sum(x * w_row) + b
# ---------------------------------------------------------------------------
def folded_mlp_kernel(x_ref, w_ref, b_ref, o_ref):
    # (tile, D) * (1, D)  -> lane reduce -> (tile, 1).  VPU multiply + XLU
    # reduce; avoids an MXU matmul with N=1 (would waste 127/255 columns).
    prod = x_ref[...] * w_ref[...]
    o_ref[...] = (jnp.sum(prod, axis=-1, keepdims=True)
                  + b_ref[...]).astype(o_ref.dtype)


@functools.partial(jax.jit, static_argnames=("block_b",))
def mlp_forward_folded(x, w_row, b_eff, *, block_b=512):
    """x: (B, in) f32.  w_row: (1, in) f32.  b_eff: (1, 1) f32."""
    B, D = x.shape
    tile = min(_round_up(B, 8), block_b)       # whole batch in one step if small
    Bp = _round_up(B, tile)
    if Bp != B:
        x = jnp.pad(x, ((0, Bp - B), (0, 0)))
    grid = (Bp // tile,)
    out = pl.pallas_call(
        folded_mlp_kernel,
        out_shape=jax.ShapeDtypeStruct((Bp, 1), x.dtype),
        grid_spec=pltpu.PrefetchScalarGridSpec(
            num_scalar_prefetch=0,
            grid=grid,
            in_specs=[
                pl.BlockSpec((tile, D), lambda i: (i, 0)),
                pl.BlockSpec((1, D), lambda i: (0, 0)),
                pl.BlockSpec((1, 1), lambda i: (0, 0)),
            ],
            out_specs=pl.BlockSpec((tile, 1), lambda i: (i, 0)),
        ),
        compiler_params=pltpu.CompilerParams(
            # Only shard across TensorCores when there is >1 batch tile.
            dimension_semantics=(("parallel",) if grid[0] > 1 else ("arbitrary",))),
    )(x, w_row, b_eff)
    return out[:B]


# ---------------------------------------------------------------------------
# Kernel 2: layered fused kernel (keeps the two big matmuls explicit).
# W1/W2 served in bf16 (halves weight HBM traffic), f32 accumulation on MXU.
# The purely affine 128->64->16->1 tail is pre-folded and done on the VPU.
# ---------------------------------------------------------------------------
def fused_mlp_kernel(x_ref, w1_ref, b1_ref, w2_ref, b2_ref, wt_ref, bt_ref, o_ref):
    h = x_ref[...]                                           # (tile, in) f32
    # Linear(in, 1024); Dropout(0.2) == identity in eval mode.
    h = jnp.dot(h.astype(jnp.bfloat16), w1_ref[...],
                preferred_element_type=jnp.float32) + b1_ref[...]
    # Linear(1024, 128); Dropout(0.2) == identity in eval mode.
    h = jnp.dot(h.astype(jnp.bfloat16), w2_ref[...],
                preferred_element_type=jnp.float32) + b2_ref[...]
    # Linear(128,64) -> Dropout(0.1) -> Linear(64,16) -> Linear(16,1):
    # pre-folded into one (1,128) row + scalar bias; VPU multiply + XLU lane
    # reduce instead of three skinny (N=64/16/1) MXU matmuls.
    o_ref[...] = (jnp.sum(h * wt_ref[...], axis=-1, keepdims=True)
                  + bt_ref[...]).astype(o_ref.dtype)
    # TODO(synk): training-mode Dropout (stochastic masking via pltpu.prng_*)
    # is not implemented; this reproduces eval()-mode forward semantics.


@functools.partial(jax.jit, static_argnames=("block_b",))
def mlp_forward_fused(x, w1, b1, w2, b2, wt, bt, *, block_b=256):
    B, D = x.shape
    tile = min(_round_up(B, 8), block_b)
    Bp = _round_up(B, tile)
    if Bp != B:
        x = jnp.pad(x, ((0, Bp - B), (0, 0)))
    grid = (Bp // tile,)
    const = lambda i: (0, 0)                     # weights identical every step
    out = pl.pallas_call(
        fused_mlp_kernel,
        out_shape=jax.ShapeDtypeStruct((Bp, 1), x.dtype),
        grid_spec=pltpu.PrefetchScalarGridSpec(
            num_scalar_prefetch=0,
            grid=grid,
            in_specs=[
                pl.BlockSpec((tile, D), lambda i: (i, 0)),
                pl.BlockSpec(w1.shape, const),
                pl.BlockSpec(b1.shape, const),
                pl.BlockSpec(w2.shape, const),
                pl.BlockSpec(b2.shape, const),
                pl.BlockSpec(wt.shape, const),
                pl.BlockSpec(bt.shape, const),
            ],
            out_specs=pl.BlockSpec((tile, 1), lambda i: (i, 0)),
        ),
        compiler_params=pltpu.CompilerParams(
            dimension_semantics=(("parallel",) if grid[0] > 1 else ("arbitrary",))),
    )(x, w1, b1, w2, b2, wt, bt)
    return out[:B]


# ---------------------------------------------------------------------------
# Init / references
# ---------------------------------------------------------------------------
def init_params(key, input_size):
    """torch.nn.Linear default init (U(-1/sqrt(fan_in), +)); W stored (in, out)."""
    dims = [input_size, 1024, 128, 64, 16, 1]
    params = []
    for i in range(len(dims) - 1):
        fan_in, fan_out = dims[i], dims[i + 1]
        key, kw, kb = jax.random.split(key, 3)
        bound = 1.0 / (fan_in ** 0.5)
        w = jax.random.uniform(kw, (fan_in, fan_out), jnp.float32, -bound, bound)
        b = jax.random.uniform(kb, (1, fan_out), jnp.float32, -bound, bound)
        params.append((w, b))
    return params


def mlp_reference(x, params):
    h = x
    for (w, b) in params:
        h = h @ w + b
    return h


def fused_reference(x, params):
    """Same casts as the fused kernel (bf16 weights/activations, f32 accum)."""
    (w1, b1), (w2, b2) = params[0], params[1]
    wt, bt = fold_affine(params[2:])
    h = jnp.dot(x.astype(jnp.bfloat16), w1.astype(jnp.bfloat16),
                preferred_element_type=jnp.float32) + b1
    h = jnp.dot(h.astype(jnp.bfloat16), w2.astype(jnp.bfloat16),
                preferred_element_type=jnp.float32) + b2
    return h @ wt + bt


if __name__ == "__main__":
    input_size = 768   # LAION CLIP embedding dim
    batch = 16

    key = jax.random.PRNGKey(0)
    key, kx = jax.random.split(key)
    x = jax.random.normal(kx, (batch, input_size), jnp.float32)
    params = init_params(key, input_size)
    ref = mlp_reference(x, params)

    # --- Path 1: fully folded head (default fast path) ---------------------
    w_full, b_full = fold_affine(params)               # (768, 1), (1, 1)
    out_folded = jax.block_until_ready(
        mlp_forward_folded(x, w_full.T, b_full))
    assert out_folded.shape == (batch, 1), out_folded.shape
    assert jnp.allclose(out_folded, ref, atol=1e-3, rtol=1e-3), (
        float(jnp.max(jnp.abs(out_folded - ref))))

    # --- Path 2: layered fused kernel (bf16 weights, folded tail) ----------
    fused_args = prepare_fused_params(params)
    out_fused = jax.block_until_ready(mlp_forward_fused(x, *fused_args))
    ref_f = fused_reference(x, params)
    assert out_fused.shape == (batch, 1), out_fused.shape
    assert jnp.allclose(out_fused, ref_f, atol=1e-3, rtol=1e-3), (
        float(jnp.max(jnp.abs(out_fused - ref_f))))
    # Loose sanity check against the exact f32 module (bf16 rounding only).
    assert jnp.allclose(out_fused, ref, atol=5e-2, rtol=5e-2), (
        float(jnp.max(jnp.abs(out_fused - ref))))

    print("KERNEL_OK")
</pallas_src>

<mosaic_0001>
module attributes {stable_mosaic.version = 11 : i64} {
  func.func @folded_mlp_kernel(%arg0: i32, %arg1: memref<16x768xf32, #tpu.memory_space<vmem>>, %arg2: memref<1x768xf32, #tpu.memory_space<vmem>>, %arg3: memref<1x1xf32, #tpu.memory_space<vmem>>, %arg4: memref<16x1xf32, #tpu.memory_space<vmem>>) attributes {dimension_semantics = [#tpu.dimension_semantics<arbitrary>], iteration_bounds = array<i64: 1>, scalar_prefetch = 0 : i64, scratch_operands = 0 : i64, tpu.core_type = #tpu.core_type<tc>, window_params = [{transform_indices = @transform_0, window_bounds = array<i64: 16, 768>}, {pipeline_mode = #tpu.pipeline_mode<synchronous>, transform_indices = @transform_1, window_bounds = array<i64: 1, 768>}, {pipeline_mode = #tpu.pipeline_mode<synchronous>, transform_indices = @transform_2, window_bounds = array<i64: 1, 1>}, {transform_indices = @transform_3, window_bounds = array<i64: 16, 1>}]} {
    %c0 = arith.constant 0 : index
    %c0_0 = arith.constant 0 : index
    %0 = vector.load %arg1[%c0, %c0_0] : memref<16x768xf32, #tpu.memory_space<vmem>>, vector<16x768xf32>
    %c0_1 = arith.constant 0 : index
    %c0_2 = arith.constant 0 : index
    %1 = vector.load %arg2[%c0_1, %c0_2] : memref<1x768xf32, #tpu.memory_space<vmem>>, vector<1x768xf32>
    %2 = vector.broadcast %1 : vector<1x768xf32> to vector<16x768xf32>
    %3 = arith.mulf %0, %2 : vector<16x768xf32>
    %cst = arith.constant dense<0.000000e+00> : vector<16xf32>
    %4 = vector.multi_reduction <add>, %3, %cst [1] : vector<16x768xf32> to vector<16xf32>
    %5 = vector.shape_cast %4 : vector<16xf32> to vector<16x1xf32>
    %c0_3 = arith.constant 0 : index
    %c0_4 = arith.constant 0 : index
    %6 = vector.load %arg3[%c0_3, %c0_4] : memref<1x1xf32, #tpu.memory_space<vmem>>, vector<1x1xf32>
    %7 = vector.broadcast %6 : vector<1x1xf32> to vector<16x1xf32>
    %8 = arith.addf %5, %7 : vector<16x1xf32>
    %c0_5 = arith.constant 0 : index
    %c0_6 = arith.constant 0 : index
    %9 = vector.load %arg4[%c0_5, %c0_6] : memref<16x1xf32, #tpu.memory_space<vmem>>, vector<16x1xf32>
    tpu.vector_store %arg4[%c0_5, %c0_6], %8 {strides = array<i32>} : memref<16x1xf32, #tpu.memory_space<vmem>>, vector<16x1xf32>,
    return
  }
  func.func @transform_0(%arg0: i32) -> (i32, i32) {
    %c0_i32 = arith.constant 0 : i32
    %c0_i32_0 = arith.constant 0 : i32
    return %arg0, %c0_i32 : i32, i32
  }
  func.func @transform_1(%arg0: i32) -> (i32, i32) {
    %c0_i32 = arith.constant 0 : i32
    %c0_i32_0 = arith.constant 0 : i32
    %c0_i32_1 = arith.constant 0 : i32
    return %c0_i32, %c0_i32_0 : i32, i32
  }
  func.func @transform_2(%arg0: i32) -> (i32, i32) {
    %c0_i32 = arith.constant 0 : i32
    %c0_i32_0 = arith.constant 0 : i32
    %c0_i32_1 = arith.constant 0 : i32
    return %c0_i32, %c0_i32_0 : i32, i32
  }
  func.func @transform_3(%arg0: i32) -> (i32, i32) {
    %c0_i32 = arith.constant 0 : i32
    %c0_i32_0 = arith.constant 0 : i32
    return %arg0, %c0_i32 : i32, i32
  }
}

</mosaic_0001>

<bundles_post_ra>
// kernel: mlp_forward_folded.1
= control target key start
LH: loop header
LB: loop body
LE: loop exit
PB: predicated region body
PF: predicated region fallthrough
CT: control target
= control target key end

     0   :  { %s218_s0 = inlined_call_operand.hbm [shape: f32[16,768], index: 0, kind: input, shape index: {}]   ;;  %s219_s1 = inlined_call_operand.hbm [shape: f32[1,768], index: 1, kind: input, shape index: {}]   ;;  %s220_s2 = inlined_call_operand.<no memory space> [shape: f32[1,1], index: 2, kind: input, shape index: {}]   ;;  %s221_s3 = inlined_call_operand.vmem [shape: f32[16,1], index: 3, kind: output, shape index: {}]  }
   0x1   :  { %v8_v0 = vstv %s220_s2 }
   0x2   :  { %9 = vst [vmem:[#allocation2] sm:$0x1] %v8_v0 }
   0x3   :  { %10 = vsyncpa [#allocation4], 0 }
   0x4   :  { %11 = vsyncpa [#allocation6], 0  ;;  %s179_s14 = smov [#allocation3]  }
   0x5   :  { %s17_s15 = sshll.u32 %s179_s14, 4  ;;  %s18_s15 = int_to_ptr.vmem [resolvable:$true] %s17_s15 }
   0x6   :  { %s143_s16 = scalar_lea.vmem %s18_s15, 1536  ;;  %p148_p1 = scmp.lt.s32.totalorder %s18_s15, %s18_s15 }
   0x7   :  { %p144_p0 = scmp.ne.s32.totalorder %s18_s15, %s143_s16  ;;  %p149_p2 = scmp.lt.s32.totalorder %s143_s16, %s143_s16 }
   0x9   :  { %p150_p3 = por %p149_p2, %p148_p1 }
   0xb   :  { %p151_p4 = pnand %p150_p3, %p144_p0 }
   0xd   :  { %154 = shalt.err (!%p151_p4)
}
   0xe   :  { %s180_s17 = smov 768   ;;  %s181_s18 = smov 48  }
   0xf   :  { %23 = dma.hbm_to_vmem [thread:$0]  %s218_s0, 1536, %s18_s15, [#allocation4], %s180_s17, %s180_s17, %s181_s18  }
  0x10   :  { %s182_s2 = smov [#allocation5]  }
  0x11   :  { %s30_s21 = sshll.u32 %s182_s2, 4  ;;  %s31_s21 = int_to_ptr.vmem [resolvable:$true] %s30_s21 }
  0x12   :  { %s163_s22 = scalar_lea.vmem %s31_s21, 96  ;;  %p168_p6 = scmp.lt.s32.totalorder %s31_s21, %s31_s21 }
  0x13   :  { %p164_p5 = scmp.ne.s32.totalorder %s31_s21, %s163_s22  ;;  %p169_p7 = scmp.lt.s32.totalorder %s163_s22, %s163_s22 }
  0x15   :  { %p170_p8 = por %p169_p7, %p168_p6 }
  0x17   :  { %p171_p9 = pnand %p170_p8, %p164_p5 }
  0x19   :  { %174 = shalt.err (!%p171_p9)
}
  0x1a   :  { %33 = dma.hbm_to_vmem [thread:$0]  %s219_s1, 96, %s31_s21, [#allocation6]  }
  0x1b   :  { %175 = dma.done.wait [#allocation4], 1536  }
  0x1c   :  { %176 = vsyncadd [#allocation4], 4294965760 }
  0x1d   :  { %177 = dma.done.wait [#allocation6], 96  }
  0x1e   :  { %178 = vsyncadd [#allocation6], 4294967200  ;;  %v56_v1 = vlaneseq  ;;  %v42_v7 = vld [vmem:[#allocation3] sm:$0xff]  ;;  %v43_v9 = vld [vmem:[#allocation3 + $0x8] sm:$0xff]  ;;  %vm121_vm0 = vcmask 7168  }
  0x1f   :  { %v44_v10 = vld [vmem:[#allocation3 + $0x10] sm:$0xff]  ;;  %v54_v11 = vld [vmem:[#allocation5] sm:$0x3f]  ;;  %v49_v18 = vld [vmem:[#allocation3 + $0x38] sm:$0xff] }
  0x20   :  { %v57_v2 = vshrl.u32 %v56_v1, 7  ;;  %v48_v17 = vld [vmem:[#allocation3 + $0x30] sm:$0xff]  ;;  %v45_v19 = vld [vmem:[#allocation3 + $0x18] sm:$0xff]  ;;  %v50_v20 = vld [vmem:[#allocation3 + $0x40] sm:$0xff] }
  0x21   :  { %v51_v25 = vld [vmem:[#allocation3 + $0x48] sm:$0xff]  ;;  %v46_v26 = vld [vmem:[#allocation3 + $0x20] sm:$0xff]  ;;  %v52_v32 = vld [vmem:[#allocation3 + $0x50] sm:$0xff] }
  0x22   :  { %v58_v3 = vsub.s32 0, %v57_v2  ;;  %v62_v4 = vsub.s32 1, %v57_v2  ;;  %v66_v5 = vsub.s32 2, %v57_v2  ;;  %v70_v6 = vsub.s32 3, %v57_v2  ;;  %v47_v34 = vld [vmem:[#allocation3 + $0x28] sm:$0xff]  ;;  %v53_v39 = vld [vmem:[#allocation3 + $0x58] sm:$0xff] }
  0x23   :  { %v74_v8 = vsub.s32 4, %v57_v2  ;;  %v78_v12 = vsub.s32 5, %v57_v2  ;;  %v130_v50 = vld [vmem:[#allocation2] ss:$0 sm:$0xff] }
  0x24   :  { %v59_v13 = vrot.slane %v54_v11, %v58_v3  ;;  %v63_v14 = vrot.slane %v54_v11, %v62_v4  ;;  %v67_v15 = vrot.slane %v54_v11, %v66_v5  ;;  %v71_v16 = vrot.slane %v54_v11, %v70_v6 }
  0x25   :  { %v75_v21 = vrot.slane %v54_v11, %v74_v8  ;;  %v79_v29 = vrot.slane %v54_v11, %v78_v12 }
  0x26   :  { %v86_v22 = vmul.f32 %v59_v13, %v42_v7  ;;  %v87_v23 = vmul.f32 %v63_v14, %v43_v9  ;;  %v88_v24 = vmul.f32 %v67_v15, %v44_v10  ;;  %v92_v27 = vmul.f32 %v59_v13, %v48_v17 }
  0x27   :  { %v93_v28 = vmul.f32 %v63_v14, %v49_v18  ;;  %v89_v30 = vmul.f32 %v71_v16, %v45_v19  ;;  %v94_v33 = vmul.f32 %v67_v15, %v50_v20  ;;  %v95_v35 = vmul.f32 %v71_v16, %v51_v25 }
  0x28   :  { %v98_v31 = vadd.f32 %v87_v23, %v86_v22  ;;  %v90_v37 = vmul.f32 %v75_v21, %v46_v26  ;;  %v96_v40 = vmul.f32 %v75_v21, %v52_v32  ;;  %v91_v42 = vmul.f32 %v79_v29, %v47_v34 }
  0x29   :  { %v105_v36 = vadd.f32 %v93_v28, %v92_v27  ;;  %v97_v46 = vmul.f32 %v79_v29, %v53_v39 }
  0x2a   :  { %v99_v38 = vadd.f32 %v98_v31, %v88_v24 }
  0x2b   :  { %v106_v41 = vadd.f32 %v105_v36, %v94_v33 }
  0x2c   :  { %v100_v43 = vadd.f32 %v99_v38, %v89_v30 }
  0x2d   :  { %v107_v44 = vadd.f32 %v106_v41, %v95_v35 }
  0x2e   :  { %v101_v45 = vadd.f32 %v100_v43, %v90_v37 }
  0x2f   :  { %v108_v47 = vadd.f32 %v107_v44, %v96_v40 }
  0x30   :  { %v102_v48 = vadd.f32 %v101_v45, %v91_v42 }
  0x31   :  { %v109_v49 = vadd.f32 %v108_v47, %v97_v46 }
  0x32   :  { %103 = vadd.xlane.f32.xlu0 %v102_v48 }
  0x36   :  { %110 = vadd.xlane.f32.xlu0 %v109_v49 }
  0xbb   :  { %v104_v51 = vpop.xlane.xlu0 %103 }
  0xbc   :  { %v119_v52 = vadd.f32 %v130_v50, %v104_v51 }
  0xbe   :  { %122 = vst.msk [vmem:[%s221_s3] sm:$0xff] %vm121_vm0, %v119_v52 }
  0xbf   :  { %v111_v53 = vpop.xlane.xlu0 %110 }
  0xc0   :  { %v120_v54 = vadd.f32 %v130_v50, %v111_v53 }
  0xc2   :  { %123 = vst.msk [vmem:[%s221_s3 + $0x8] sm:$0xff] %vm121_vm0, %v120_v54 }
  0xc3   :  { %128 = vsyncpa [#allocation4], 1 }
  0xc4   :  { %129 = vsyncpa [#allocation6], 1 }

</bundles_post_ra>
